<compile_context>
chip_gen: v6e
topology: v6e:2x2x1
jax: 0.10.0
libtpu: 0.0.40
codegen_flags: <defaults>
</compile_context>

<pallas_src>
import functools

import jax
import jax.numpy as jnp
from jax.experimental import pallas as pl
from jax.experimental.pallas import tpu as pltpu


def _round_up(n, m):
    return ((n + m - 1) // m) * m


def _pick_tile(n, preferred):
    """Largest divisor of n that is a multiple of 8 and <= preferred, else n."""
    for t in range(min(preferred, n), 0, -1):
        if n % t == 0 and (t % 8 == 0 or t == n):
            return t
    return n


def _tpu_budgets():
    """(vmem_limit_bytes, default_tile) picked from the local TPU generation."""
    vmem_cap = 64 * 1024 * 1024            # conservative default (v7x-sized)
    try:
        info = pltpu.get_tpu_info()
        vmem_cap = int(getattr(info, "vmem_capacity_bytes", vmem_cap))
    except Exception:
        pass
    limit = min(vmem_cap * 3 // 4, 100 * 1024 * 1024)   # leave headroom
    tile = 512 if vmem_cap >= 96 * 1024 * 1024 else 256  # v5e/v6e vs v7x
    return int(limit), tile


def _const_spec(shape, buffers):
    """BlockSpec for a grid-invariant (weight / bias) operand."""
    index_map = lambda *_: (0,) * len(shape)
    if buffers == 1:
        # Never re-fetched across the grid -> single buffer halves its VMEM.
        return pl.BlockSpec(shape, index_map, pipeline_mode=pl.Buffered(1))
    return pl.BlockSpec(shape, index_map)


# ----------------------------------------------------------------------------
# Kernels
# ----------------------------------------------------------------------------
def _qkv_proj_kernel(x_ref, wq_ref, bq_ref, wk_ref, wv_ref, bv_ref,
                     q_ref, k_ref, v_ref):
    x = x_ref[...]                                           # (tn, D) bf16
    q = jnp.dot(x, wq_ref[...], preferred_element_type=jnp.float32) + bq_ref[...]
    k = jnp.dot(x, wk_ref[...], preferred_element_type=jnp.float32)
    v = jnp.dot(x, wv_ref[...], preferred_element_type=jnp.float32) + bv_ref[...]
    q_ref[...] = q.astype(q_ref.dtype)
    k_ref[...] = k.astype(k_ref.dtype)
    v_ref[...] = v.astype(v_ref.dtype)


def _linear_kernel(x_ref, w_ref, b_ref, o_ref):
    o_ref[...] = (jnp.dot(x_ref[...], w_ref[...],
                          preferred_element_type=jnp.float32)
                  + b_ref[...]).astype(o_ref.dtype)


def _attn_kernel(q_ref, k_ref, v_ref, wv_ref, *qk_refs, causal, n_heads, dh,
                 kv_len, softmax_dtype):
    qk_ref = qk_refs[0] if qk_refs else None
    tq = q_ref.shape[1]
    tkv = k_ref.shape[1]

    q = q_ref[0]                 # (tq,  hb*dh), pre-scaled by dh**-0.25
    k = k_ref[0]                 # (tkv, hb*dh), pre-scaled
    v = v_ref[0]                 # (tkv, hb*dh)

    # Mask (shared by every head in the block) built from iota, hoisted out of
    # the head loop.  Padded key columns (tkv > kv_len) are always masked out.
    mask = None
    if causal:
        rows = pl.program_id(2) * tq + jax.lax.broadcasted_iota(
            jnp.int32, (tq, tkv), 0)
        cols = jax.lax.broadcasted_iota(jnp.int32, (tq, tkv), 1)
        mask = cols <= rows
        if tkv > kv_len:
            mask &= cols < kv_len
    elif tkv > kv_len:
        cols = jax.lax.broadcasted_iota(jnp.int32, (tq, tkv), 1)
        mask = cols < kv_len

    outs = []
    for h in range(n_heads):     # static unroll over the head group
        sl = slice(h * dh, (h + 1) * dh)
        # scores (tq, tkv) = q_h @ k_h^T, f32 accumulation on the MXU.
        s = jax.lax.dot_general(q[:, sl], k[:, sl], (((1,), (1,)), ((), ())),
                                preferred_element_type=jnp.float32)
        if mask is not None:
            s = jnp.where(mask, s, -jnp.inf)
        if qk_ref is not None:   # lane-dense (last dim = tkv) store, optional
            qk_ref[0, h] = s.astype(qk_ref.dtype)
        # softmax over keys; divide goes to the EUP slot (approx reciprocal).
        m = jnp.max(s, axis=-1, keepdims=True)
        e = jnp.exp((s - m).astype(softmax_dtype)).astype(jnp.float32)
        p = e * pl.reciprocal(jnp.sum(e, axis=-1, keepdims=True), approx=True)
        outs.append(jnp.dot(p.astype(v.dtype), v[:, sl],
                            preferred_element_type=jnp.float32))

    # One lane-dense (tq, hb*dh) store for the whole head group.
    wv_ref[0] = jnp.concatenate(outs, axis=-1).astype(wv_ref.dtype)


# ----------------------------------------------------------------------------
# Forward
# ----------------------------------------------------------------------------
def mha_forward(x, params, n_head, *, causal=False, return_qk=True,
                compute_dtype=jnp.bfloat16, qk_dtype=jnp.float32,
                softmax_dtype=jnp.float32, q_tile=None, row_tile=None,
                heads_per_block=None, weight_buffers=1):
    """x: (B, T, D).  params: pre-transposed weights (in, out) + biases (D,).

    Returns (out, qk); qk is None when return_qk=False.
    """
    B, T, D = x.shape
    assert D % n_head == 0
    dh = D // n_head
    cd = jnp.dtype(compute_dtype)
    isz = cd.itemsize
    scale = float(dh) ** (-0.25)

    vmem_limit, default_tile = _tpu_budgets()
    if q_tile is None:
        q_tile = default_tile
    if row_tile is None:
        row_tile = default_tile

    # Head grouping: smallest group whose lane width hb*dh is a multiple of
    # 128 (lane-dense wv stores; 2 heads for Whisper's dh=64), falling back to
    # all heads (block width == D) when dh can't tile 128.
    if heads_per_block is None:
        heads_per_block = n_head
        for cand in range(1, n_head):
            if n_head % cand == 0 and (cand * dh) % 128 == 0:
                heads_per_block = cand
                break
    hb = heads_per_block
    assert n_head % hb == 0
    hw = hb * dh
    assert hw % 128 == 0 or hw == D, \
        "heads_per_block*dh must be a multiple of 128 or cover all heads"

    # Pad the sequence so a capped, 8-aligned q tile always divides it
    # (padded keys are masked in-kernel; padded rows are sliced off at the end).
    tq = _round_up(min(q_tile, T), 8)
    Tp = _round_up(T, tq)
    if Tp != T:
        x = jnp.pad(x, ((0, 0), (0, Tp - T), (0, 0)))
    N = B * Tp

    # Fold the dh**-0.25 scaling into the Q/K projection params (host, once).
    wq = (params["wq_t"] * scale).astype(cd)
    bq = (params["bq"] * scale).reshape(1, D).astype(jnp.float32)
    wk = (params["wk_t"] * scale).astype(cd)
    wv_w = params["wv_t"].astype(cd)
    bv = params["bv"].reshape(1, D).astype(jnp.float32)
    wo = params["wo_t"].astype(cd)
    bo = params["bo"].reshape(1, D).astype(jnp.float32)

    x2 = x.reshape(N, D).astype(cd)
    tn = _pick_tile(N, max(row_tile, tq))
    assert N % tn == 0 and (tn % 8 == 0 or tn == N)

    row_cparams = pltpu.CompilerParams(
        dimension_semantics=("parallel",),
        vmem_limit_bytes=vmem_limit)

    # ---- 1) fused QKV projection over (B*Tp) row tiles ----------------------
    q2, k2, v2 = pl.pallas_call(
        _qkv_proj_kernel,
        out_shape=(jax.ShapeDtypeStruct((N, D), cd),) * 3,
        grid_spec=pltpu.PrefetchScalarGridSpec(
            num_scalar_prefetch=0,
            grid=(N // tn,),
            in_specs=[
                pl.BlockSpec((tn, D), lambda i: (i, 0)),   # x rows
                _const_spec((D, D), weight_buffers),       # Wq^T (pre-scaled)
                _const_spec((1, D), weight_buffers),       # bq   (pre-scaled)
                _const_spec((D, D), weight_buffers),       # Wk^T (pre-scaled)
                _const_spec((D, D), weight_buffers),       # Wv^T
                _const_spec((1, D), weight_buffers),       # bv
            ],
            out_specs=[pl.BlockSpec((tn, D), lambda i: (i, 0))] * 3,
        ),
        compiler_params=row_cparams,
        cost_estimate=pl.CostEstimate(
            flops=int(6 * N * D * D), transcendentals=0,
            bytes_accessed=int(4 * N * D * isz + 3 * D * D * isz + 2 * D * 4)),
    )(x2, wq, bq, wk, wv_w, bv)

    # Free layout plumbing only (no XLA transposes): (B*Tp, D) -> (B, Tp, D).
    q3 = q2.reshape(B, Tp, D)
    k3 = k2.reshape(B, Tp, D)
    v3 = v2.reshape(B, Tp, D)

    # ---- 2) attention: grid (B, H/hb, Tp/tq); head group via index_map ------
    qk_isz = jnp.dtype(qk_dtype).itemsize
    attn_out_shape = [jax.ShapeDtypeStruct((B, Tp, D), cd)]
    attn_out_specs = [pl.BlockSpec((1, tq, hw), lambda b, h, t: (b, t, h))]
    if return_qk:
        attn_out_shape.append(jax.ShapeDtypeStruct((B, n_head, Tp, Tp), qk_dtype))
        attn_out_specs.append(
            pl.BlockSpec((1, hb, tq, Tp), lambda b, h, t: (b, h, t, 0)))

    attn_out = pl.pallas_call(
        functools.partial(_attn_kernel, causal=causal, n_heads=hb, dh=dh,
                          kv_len=T, softmax_dtype=softmax_dtype),
        out_shape=tuple(attn_out_shape),
        grid_spec=pltpu.PrefetchScalarGridSpec(
            num_scalar_prefetch=0,
            grid=(B, n_head // hb, Tp // tq),
            in_specs=[
                pl.BlockSpec((1, tq, hw), lambda b, h, t: (b, t, h)),   # Q
                pl.BlockSpec((1, Tp, hw), lambda b, h, t: (b, 0, h)),   # K
                pl.BlockSpec((1, Tp, hw), lambda b, h, t: (b, 0, h)),   # V
            ],
            out_specs=attn_out_specs,
        ),
        compiler_params=pltpu.CompilerParams(
            dimension_semantics=("parallel", "parallel", "parallel"),
            vmem_limit_bytes=vmem_limit),
        cost_estimate=pl.CostEstimate(
            flops=int(4 * B * n_head * Tp * Tp * dh),
            transcendentals=int(B * n_head * Tp * Tp),
            bytes_accessed=int(4 * B * n_head * Tp * dh * isz
                               + (B * n_head * Tp * Tp * qk_isz
                                  if return_qk else 0))),
    )(q3, k3, v3)

    wv3 = attn_out[0]
    qk = attn_out[1] if return_qk else None

    # ---- 3) output projection over (B*Tp) row tiles --------------------------
    wv2 = wv3.reshape(N, D)     # free: same (B*T, H*dh) layout
    out2 = pl.pallas_call(
        _linear_kernel,
        out_shape=jax.ShapeDtypeStruct((N, D), x.dtype),
        grid_spec=pltpu.PrefetchScalarGridSpec(
            num_scalar_prefetch=0,
            grid=(N // tn,),
            in_specs=[
                pl.BlockSpec((tn, D), lambda i: (i, 0)),   # wv rows
                _const_spec((D, D), weight_buffers),       # Wo^T
                _const_spec((1, D), weight_buffers),       # bo
            ],
            out_specs=pl.BlockSpec((tn, D), lambda i: (i, 0)),
        ),
        compiler_params=row_cparams,
        cost_estimate=pl.CostEstimate(
            flops=int(2 * N * D * D), transcendentals=0,
            bytes_accessed=int(N * D * isz + D * D * isz + N * D * 4 + D * 4)),
    )(wv2, wo, bo)

    out = out2.reshape(B, Tp, D)
    if Tp != T:
        out = out[:, :T]
        if qk is not None:
            qk = qk[:, :, :T, :T]
    return out, qk


# ----------------------------------------------------------------------------
# Pure-JAX reference (reproduces the PyTorch forward)
# ----------------------------------------------------------------------------
def mha_reference(x, params, n_head, causal=False):
    B, T, D = x.shape
    dh = D // n_head
    scale = float(dh) ** (-0.25)
    q = x @ params["wq_t"] + params["bq"]
    k = x @ params["wk_t"]
    v = x @ params["wv_t"] + params["bv"]
    qh = q.reshape(B, T, n_head, dh).transpose(0, 2, 1, 3) * scale
    kh = k.reshape(B, T, n_head, dh).transpose(0, 2, 3, 1) * scale
    vh = v.reshape(B, T, n_head, dh).transpose(0, 2, 1, 3)
    qk = (qh @ kh).astype(jnp.float32)
    if causal:
        mask = jnp.triu(jnp.full((T, T), -jnp.inf, dtype=jnp.float32), k=1)
        qk = qk + mask[None, None]
    w = jax.nn.softmax(qk, axis=-1)
    wv = (w @ vh).transpose(0, 2, 1, 3).reshape(B, T, D)
    out = wv @ params["wo_t"] + params["bo"]
    return out, qk


if __name__ == "__main__":
    B, T, D, H = 2, 8, 32, 4   # batch, seq, n_state, n_head (toy shapes)

    key = jax.random.PRNGKey(0)
    keys = jax.random.split(key, 8)
    init = lambda k, shape: (0.02 * jax.random.normal(k, shape)).astype(jnp.float32)

    # PyTorch Linear weight is (out, in); store transposed (in, out).
    params = {
        "wq_t": init(keys[0], (D, D)),
        "bq":   init(keys[1], (D,)),
        "wk_t": init(keys[2], (D, D)),
        "wv_t": init(keys[3], (D, D)),
        "bv":   init(keys[4], (D,)),
        "wo_t": init(keys[5], (D, D)),
        "bo":   init(keys[6], (D,)),
    }
    x = jax.random.normal(keys[7], (B, T, D), dtype=jnp.float32)

    def run_checks(weight_buffers):
        # bf16 matmul inputs (f32 accumulation) => loosened tolerances vs f32 ref.
        tol = dict(atol=2e-2, rtol=2e-2)

        # 1) causal (decoder-style), f32 qk returned.
        out, qk = mha_forward(x, params, H, causal=True,
                              weight_buffers=weight_buffers)
        jax.block_until_ready(out); jax.block_until_ready(qk)
        out_ref, qk_ref = mha_reference(x, params, H, causal=True)
        assert jnp.allclose(out, out_ref, **tol), "out mismatch (causal)"
        assert jnp.allclose(qk, qk_ref, **tol), "qk mismatch (causal)"

        # 2) non-causal (encoder-style), bf16 qk (perf-review fast path).
        out, qk = mha_forward(x, params, H, causal=False,
                              qk_dtype=jnp.bfloat16,
                              weight_buffers=weight_buffers)
        jax.block_until_ready(out); jax.block_until_ready(qk)
        out_ref, qk_ref = mha_reference(x, params, H, causal=False)
        assert jnp.allclose(out, out_ref, **tol), "out mismatch (encoder)"
        assert jnp.allclose(qk.astype(jnp.float32), qk_ref, **tol), \
            "qk mismatch (encoder, bf16 qk)"

        # 3) qk dropped entirely (cheapest path when scores aren't consumed).
        out, qk_none = mha_forward(x, params, H, causal=False, return_qk=False,
                                   weight_buffers=weight_buffers)
        jax.block_until_ready(out)
        assert qk_none is None
        assert jnp.allclose(out, out_ref, **tol), "out mismatch (no-qk path)"

    try:
        run_checks(weight_buffers=1)        # single-buffered constant weights
    except Exception:
        # TODO(synk): some jax versions reject pl.Buffered(1) on pallas_call
        # operands; fall back to default double-buffered weights.
        run_checks(weight_buffers=2)

    print("KERNEL_OK")
</pallas_src>

<mosaic_0001>
module attributes {stable_mosaic.version = 11 : i64} {
  func.func @_qkv_proj_kernel(%arg0: i32, %arg1: memref<16x32xbf16, #tpu.memory_space<vmem>>, %arg2: memref<32x32xbf16, #tpu.memory_space<vmem>>, %arg3: memref<1x32xf32, #tpu.memory_space<vmem>>, %arg4: memref<32x32xbf16, #tpu.memory_space<vmem>>, %arg5: memref<32x32xbf16, #tpu.memory_space<vmem>>, %arg6: memref<1x32xf32, #tpu.memory_space<vmem>>, %arg7: memref<16x32xbf16, #tpu.memory_space<vmem>>, %arg8: memref<16x32xbf16, #tpu.memory_space<vmem>>, %arg9: memref<16x32xbf16, #tpu.memory_space<vmem>>) attributes {dimension_semantics = [#tpu.dimension_semantics<parallel>], iteration_bounds = array<i64: 1>, scalar_prefetch = 0 : i64, scratch_operands = 0 : i64, tpu.core_type = #tpu.core_type<tc>, window_params = [{transform_indices = @transform_0, window_bounds = array<i64: 16, 32>}, {pipeline_mode = #tpu.pipeline_mode<synchronous>, transform_indices = @transform_1, window_bounds = array<i64: 32, 32>}, {pipeline_mode = #tpu.pipeline_mode<synchronous>, transform_indices = @transform_2, window_bounds = array<i64: 1, 32>}, {pipeline_mode = #tpu.pipeline_mode<synchronous>, transform_indices = @transform_3, window_bounds = array<i64: 32, 32>}, {pipeline_mode = #tpu.pipeline_mode<synchronous>, transform_indices = @transform_4, window_bounds = array<i64: 32, 32>}, {pipeline_mode = #tpu.pipeline_mode<synchronous>, transform_indices = @transform_5, window_bounds = array<i64: 1, 32>}, {transform_indices = @transform_6, window_bounds = array<i64: 16, 32>}, {transform_indices = @transform_7, window_bounds = array<i64: 16, 32>}, {transform_indices = @transform_8, window_bounds = array<i64: 16, 32>}]} {
    %c0 = arith.constant 0 : index
    %c0_0 = arith.constant 0 : index
    %0 = vector.load %arg1[%c0, %c0_0] : memref<16x32xbf16, #tpu.memory_space<vmem>>, vector<16x32xbf16>
    %c0_1 = arith.constant 0 : index
    %c0_2 = arith.constant 0 : index
    %1 = vector.load %arg2[%c0_1, %c0_2] : memref<32x32xbf16, #tpu.memory_space<vmem>>, vector<32x32xbf16>
    %cst = arith.constant dense<0.000000e+00> : vector<16x32xf32>
    %2 = tpu.matmul %0, %1, %cst {dimension_numbers = #tpu.dot_dimension_numbers<[1], [0], [0], [1], [0, 0, 1, 1], [], []>} : vector<16x32xbf16>, vector<32x32xbf16>, vector<16x32xf32> -> vector<16x32xf32>
    %c0_3 = arith.constant 0 : index
    %c0_4 = arith.constant 0 : index
    %3 = vector.load %arg3[%c0_3, %c0_4] : memref<1x32xf32, #tpu.memory_space<vmem>>, vector<1x32xf32>
    %4 = vector.broadcast %3 : vector<1x32xf32> to vector<16x32xf32>
    %5 = arith.addf %2, %4 : vector<16x32xf32>
    %c0_5 = arith.constant 0 : index
    %c0_6 = arith.constant 0 : index
    %6 = vector.load %arg4[%c0_5, %c0_6] : memref<32x32xbf16, #tpu.memory_space<vmem>>, vector<32x32xbf16>
    %cst_7 = arith.constant dense<0.000000e+00> : vector<16x32xf32>
    %7 = tpu.matmul %0, %6, %cst_7 {dimension_numbers = #tpu.dot_dimension_numbers<[1], [0], [0], [1], [0, 0, 1, 1], [], []>} : vector<16x32xbf16>, vector<32x32xbf16>, vector<16x32xf32> -> vector<16x32xf32>
    %c0_8 = arith.constant 0 : index
    %c0_9 = arith.constant 0 : index
    %8 = vector.load %arg5[%c0_8, %c0_9] : memref<32x32xbf16, #tpu.memory_space<vmem>>, vector<32x32xbf16>
    %cst_10 = arith.constant dense<0.000000e+00> : vector<16x32xf32>
    %9 = tpu.matmul %0, %8, %cst_10 {dimension_numbers = #tpu.dot_dimension_numbers<[1], [0], [0], [1], [0, 0, 1, 1], [], []>} : vector<16x32xbf16>, vector<32x32xbf16>, vector<16x32xf32> -> vector<16x32xf32>
    %c0_11 = arith.constant 0 : index
    %c0_12 = arith.constant 0 : index
    %10 = vector.load %arg6[%c0_11, %c0_12] : memref<1x32xf32, #tpu.memory_space<vmem>>, vector<1x32xf32>
    %11 = vector.broadcast %10 : vector<1x32xf32> to vector<16x32xf32>
    %12 = arith.addf %9, %11 : vector<16x32xf32>
    %13 = arith.truncf %5 : vector<16x32xf32> to vector<16x32xbf16>
    %c0_13 = arith.constant 0 : index
    %c0_14 = arith.constant 0 : index
    %14 = vector.load %arg7[%c0_13, %c0_14] : memref<16x32xbf16, #tpu.memory_space<vmem>>, vector<16x32xbf16>
    tpu.vector_store %arg7[%c0_13, %c0_14], %13 {strides = array<i32>} : memref<16x32xbf16, #tpu.memory_space<vmem>>, vector<16x32xbf16>,
    %15 = arith.truncf %7 : vector<16x32xf32> to vector<16x32xbf16>
    %c0_15 = arith.constant 0 : index
    %c0_16 = arith.constant 0 : index
    %16 = vector.load %arg8[%c0_15, %c0_16] : memref<16x32xbf16, #tpu.memory_space<vmem>>, vector<16x32xbf16>
    tpu.vector_store %arg8[%c0_15, %c0_16], %15 {strides = array<i32>} : memref<16x32xbf16, #tpu.memory_space<vmem>>, vector<16x32xbf16>,
    %17 = arith.truncf %12 : vector<16x32xf32> to vector<16x32xbf16>
    %c0_17 = arith.constant 0 : index
    %c0_18 = arith.constant 0 : index
    %18 = vector.load %arg9[%c0_17, %c0_18] : memref<16x32xbf16, #tpu.memory_space<vmem>>, vector<16x32xbf16>
    tpu.vector_store %arg9[%c0_17, %c0_18], %17 {strides = array<i32>} : memref<16x32xbf16, #tpu.memory_space<vmem>>, vector<16x32xbf16>,
    return
  }
  func.func @transform_0(%arg0: i32) -> (i32, i32) {
    %c0_i32 = arith.constant 0 : i32
    %c0_i32_0 = arith.constant 0 : i32
    return %arg0, %c0_i32 : i32, i32
  }
  func.func @transform_1(%arg0: i32) -> (i32, i32) {
    %c0_i32 = arith.constant 0 : i32
    %c0_i32_0 = arith.constant 0 : i32
    %c0_i32_1 = arith.constant 0 : i32
    return %c0_i32, %c0_i32_0 : i32, i32
  }
  func.func @transform_2(%arg0: i32) -> (i32, i32) {
    %c0_i32 = arith.constant 0 : i32
    %c0_i32_0 = arith.constant 0 : i32
    %c0_i32_1 = arith.constant 0 : i32
    return %c0_i32, %c0_i32_0 : i32, i32
  }
  func.func @transform_3(%arg0: i32) -> (i32, i32) {
    %c0_i32 = arith.constant 0 : i32
    %c0_i32_0 = arith.constant 0 : i32
    %c0_i32_1 = arith.constant 0 : i32
    return %c0_i32, %c0_i32_0 : i32, i32
  }
  func.func @transform_4(%arg0: i32) -> (i32, i32) {
    %c0_i32 = arith.constant 0 : i32
    %c0_i32_0 = arith.constant 0 : i32
    %c0_i32_1 = arith.constant 0 : i32
    return %c0_i32, %c0_i32_0 : i32, i32
  }
  func.func @transform_5(%arg0: i32) -> (i32, i32) {
    %c0_i32 = arith.constant 0 : i32
    %c0_i32_0 = arith.constant 0 : i32
    %c0_i32_1 = arith.constant 0 : i32
    return %c0_i32, %c0_i32_0 : i32, i32
  }
  func.func @transform_6(%arg0: i32) -> (i32, i32) {
    %c0_i32 = arith.constant 0 : i32
    %c0_i32_0 = arith.constant 0 : i32
    return %arg0, %c0_i32 : i32, i32
  }
  func.func @transform_7(%arg0: i32) -> (i32, i32) {
    %c0_i32 = arith.constant 0 : i32
    %c0_i32_0 = arith.constant 0 : i32
    return %arg0, %c0_i32 : i32, i32
  }
  func.func @transform_8(%arg0: i32) -> (i32, i32) {
    %c0_i32 = arith.constant 0 : i32
    %c0_i32_0 = arith.constant 0 : i32
    return %arg0, %c0_i32 : i32, i32
  }
}

module attributes {stable_mosaic.version = 11 : i64} {
  func.func @_qkv_proj_kernel(%arg0: i32, %arg1: memref<16x32xbf16, #tpu.memory_space<vmem>>, %arg2: memref<32x32xbf16, #tpu.memory_space<vmem>>, %arg3: memref<1x32xf32, #tpu.memory_space<vmem>>, %arg4: memref<32x32xbf16, #tpu.memory_space<vmem>>, %arg5: memref<32x32xbf16, #tpu.memory_space<vmem>>, %arg6: memref<1x32xf32, #tpu.memory_space<vmem>>, %arg7: memref<16x32xbf16, #tpu.memory_space<vmem>>, %arg8: memref<16x32xbf16, #tpu.memory_space<vmem>>, %arg9: memref<16x32xbf16, #tpu.memory_space<vmem>>) attributes {dimension_semantics = [#tpu.dimension_semantics<parallel>], iteration_bounds = array<i64: 1>, scalar_prefetch = 0 : i64, scratch_operands = 0 : i64, tpu.core_type = #tpu.core_type<tc>, window_params = [{transform_indices = @transform_0, window_bounds = array<i64: 16, 32>}, {pipeline_mode = #tpu.pipeline_mode<synchronous>, transform_indices = @transform_1, window_bounds = array<i64: 32, 32>}, {pipeline_mode = #tpu.pipeline_mode<synchronous>, transform_indices = @transform_2, window_bounds = array<i64: 1, 32>}, {pipeline_mode = #tpu.pipeline_mode<synchronous>, transform_indices = @transform_3, window_bounds = array<i64: 32, 32>}, {pipeline_mode = #tpu.pipeline_mode<synchronous>, transform_indices = @transform_4, window_bounds = array<i64: 32, 32>}, {pipeline_mode = #tpu.pipeline_mode<synchronous>, transform_indices = @transform_5, window_bounds = array<i64: 1, 32>}, {transform_indices = @transform_6, window_bounds = array<i64: 16, 32>}, {transform_indices = @transform_7, window_bounds = array<i64: 16, 32>}, {transform_indices = @transform_8, window_bounds = array<i64: 16, 32>}]} {
    %c0 = arith.constant 0 : index
    %c0_0 = arith.constant 0 : index
    %0 = vector.load %arg1[%c0, %c0_0] : memref<16x32xbf16, #tpu.memory_space<vmem>>, vector<16x32xbf16>
    %c0_1 = arith.constant 0 : index
    %c0_2 = arith.constant 0 : index
    %1 = vector.load %arg2[%c0_1, %c0_2] : memref<32x32xbf16, #tpu.memory_space<vmem>>, vector<32x32xbf16>
    %cst = arith.constant dense<0.000000e+00> : vector<16x32xf32>
    %2 = tpu.matmul %0, %1, %cst {dimension_numbers = #tpu.dot_dimension_numbers<[1], [0], [0], [1], [0, 0, 1, 1], [], []>} : vector<16x32xbf16>, vector<32x32xbf16>, vector<16x32xf32> -> vector<16x32xf32>
    %c0_3 = arith.constant 0 : index
    %c0_4 = arith.constant 0 : index
    %3 = vector.load %arg3[%c0_3, %c0_4] : memref<1x32xf32, #tpu.memory_space<vmem>>, vector<1x32xf32>
    %4 = vector.broadcast %3 : vector<1x32xf32> to vector<16x32xf32>
    %5 = arith.addf %2, %4 : vector<16x32xf32>
    %c0_5 = arith.constant 0 : index
    %c0_6 = arith.constant 0 : index
    %6 = vector.load %arg4[%c0_5, %c0_6] : memref<32x32xbf16, #tpu.memory_space<vmem>>, vector<32x32xbf16>
    %cst_7 = arith.constant dense<0.000000e+00> : vector<16x32xf32>
    %7 = tpu.matmul %0, %6, %cst_7 {dimension_numbers = #tpu.dot_dimension_numbers<[1], [0], [0], [1], [0, 0, 1, 1], [], []>} : vector<16x32xbf16>, vector<32x32xbf16>, vector<16x32xf32> -> vector<16x32xf32>
    %c0_8 = arith.constant 0 : index
    %c0_9 = arith.constant 0 : index
    %8 = vector.load %arg5[%c0_8, %c0_9] : memref<32x32xbf16, #tpu.memory_space<vmem>>, vector<32x32xbf16>
    %cst_10 = arith.constant dense<0.000000e+00> : vector<16x32xf32>
    %9 = tpu.matmul %0, %8, %cst_10 {dimension_numbers = #tpu.dot_dimension_numbers<[1], [0], [0], [1], [0, 0, 1, 1], [], []>} : vector<16x32xbf16>, vector<32x32xbf16>, vector<16x32xf32> -> vector<16x32xf32>
    %c0_11 = arith.constant 0 : index
    %c0_12 = arith.constant 0 : index
    %10 = vector.load %arg6[%c0_11, %c0_12] : memref<1x32xf32, #tpu.memory_space<vmem>>, vector<1x32xf32>
    %11 = vector.broadcast %10 : vector<1x32xf32> to vector<16x32xf32>
    %12 = arith.addf %9, %11 : vector<16x32xf32>
    %13 = arith.truncf %5 : vector<16x32xf32> to vector<16x32xbf16>
    %c0_13 = arith.constant 0 : index
    %c0_14 = arith.constant 0 : index
    %14 = vector.load %arg7[%c0_13, %c0_14] : memref<16x32xbf16, #tpu.memory_space<vmem>>, vector<16x32xbf16>
    tpu.vector_store %arg7[%c0_13, %c0_14], %13 {strides = array<i32>} : memref<16x32xbf16, #tpu.memory_space<vmem>>, vector<16x32xbf16>,
    %15 = arith.truncf %7 : vector<16x32xf32> to vector<16x32xbf16>
    %c0_15 = arith.constant 0 : index
    %c0_16 = arith.constant 0 : index
    %16 = vector.load %arg8[%c0_15, %c0_16] : memref<16x32xbf16, #tpu.memory_space<vmem>>, vector<16x32xbf16>
    tpu.vector_store %arg8[%c0_15, %c0_16], %15 {strides = array<i32>} : memref<16x32xbf16, #tpu.memory_space<vmem>>, vector<16x32xbf16>,
    %17 = arith.truncf %12 : vector<16x32xf32> to vector<16x32xbf16>
    %c0_17 = arith.constant 0 : index
    %c0_18 = arith.constant 0 : index
    %18 = vector.load %arg9[%c0_17, %c0_18] : memref<16x32xbf16, #tpu.memory_space<vmem>>, vector<16x32xbf16>
    tpu.vector_store %arg9[%c0_17, %c0_18], %17 {strides = array<i32>} : memref<16x32xbf16, #tpu.memory_space<vmem>>, vector<16x32xbf16>,
    return
  }
  func.func @transform_0(%arg0: i32) -> (i32, i32) {
    %c0_i32 = arith.constant 0 : i32
    %c0_i32_0 = arith.constant 0 : i32
    return %arg0, %c0_i32 : i32, i32
  }
  func.func @transform_1(%arg0: i32) -> (i32, i32) {
    %c0_i32 = arith.constant 0 : i32
    %c0_i32_0 = arith.constant 0 : i32
    %c0_i32_1 = arith.constant 0 : i32
    return %c0_i32, %c0_i32_0 : i32, i32
  }
  func.func @transform_2(%arg0: i32) -> (i32, i32) {
    %c0_i32 = arith.constant 0 : i32
    %c0_i32_0 = arith.constant 0 : i32
    %c0_i32_1 = arith.constant 0 : i32
    return %c0_i32, %c0_i32_0 : i32, i32
  }
  func.func @transform_3(%arg0: i32) -> (i32, i32) {
    %c0_i32 = arith.constant 0 : i32
    %c0_i32_0 = arith.constant 0 : i32
    %c0_i32_1 = arith.constant 0 : i32
    return %c0_i32, %c0_i32_0 : i32, i32
  }
  func.func @transform_4(%arg0: i32) -> (i32, i32) {
    %c0_i32 = arith.constant 0 : i32
    %c0_i32_0 = arith.constant 0 : i32
    %c0_i32_1 = arith.constant 0 : i32
    return %c0_i32, %c0_i32_0 : i32, i32
  }
  func.func @transform_5(%arg0: i32) -> (i32, i32) {
    %c0_i32 = arith.constant 0 : i32
    %c0_i32_0 = arith.constant 0 : i32
    %c0_i32_1 = arith.constant 0 : i32
    return %c0_i32, %c0_i32_0 : i32, i32
  }
  func.func @transform_6(%arg0: i32) -> (i32, i32) {
    %c0_i32 = arith.constant 0 : i32
    %c0_i32_0 = arith.constant 0 : i32
    return %arg0, %c0_i32 : i32, i32
  }
  func.func @transform_7(%arg0: i32) -> (i32, i32) {
    %c0_i32 = arith.constant 0 : i32
    %c0_i32_0 = arith.constant 0 : i32
    return %arg0, %c0_i32 : i32, i32
  }
  func.func @transform_8(%arg0: i32) -> (i32, i32) {
    %c0_i32 = arith.constant 0 : i32
    %c0_i32_0 = arith.constant 0 : i32
    return %arg0, %c0_i32 : i32, i32
  }
}

</mosaic_0001>

<bundles_post_ra>
// kernel: tpu_custom_call.1
= control target key start
LH: loop header
LB: loop body
LE: loop exit
PB: predicated region body
PF: predicated region fallthrough
CT: control target
= control target key end

     0   :  { %14 = vsyncpa [#allocation3], 0  ;;  %s699_s0 = inlined_call_operand.hbm [shape: bf16[16,32], index: 0, kind: input, shape index: {}]   ;;  %s700_s1 = inlined_call_operand.hbm [shape: bf16[32,32], index: 1, kind: input, shape index: {}]   ;;  %s701_s2 = inlined_call_operand.vmem [shape: f32[1,32], index: 2, kind: input, shape index: {}]   ;;  %s702_s3 = inlined_call_operand.hbm [shape: bf16[32,32], index: 3, kind: input, shape index: {}]   ;;  %s703_s4 = inlined_call_operand.hbm [shape: bf16[32,32], index: 4, kind: input, shape index: {}]   ;;  %s704_s5 = inlined_call_operand.vmem [shape: f32[1,32], index: 5, kind: input, shape index: {}]   ;;  %s705_s6 = inlined_call_operand.hbm [shape: bf16[16,32], index: 6, kind: output, shape index: {0}]   ;;  %s706_s7 = inlined_call_operand.hbm [shape: bf16[16,32], index: 7, kind: output, shape index: {1}]   ;;  %s707_s8 = inlined_call_operand.hbm [shape: bf16[16,32], index: 8, kind: output, shape index: {2}]  }
   0x1   :  { %15 = vsyncpa [#allocation6], 0 }
   0x2   :  { %16 = vsyncpa [#allocation9], 0 }
   0x3   :  { %17 = vsyncpa [#allocation4], 0 }
   0x4   :  { %18 = vsyncpa [#allocation12], 0  ;;  %s586_s27 = smov [#allocation5]   ;;  %s587_s29 = smov [#allocation2]  }
   0x5   :  { %s36_s28 = sshll.u32 %s586_s27, 4  ;;  %s24_s30 = sshll.u32 %s587_s29, 4  ;;  %s37_s28 = int_to_ptr.vmem [resolvable:$true] %s36_s28  ;;  %s25_s30 = int_to_ptr.vmem [resolvable:$true] %s24_s30 }
   0x6   :  { %s444_s9 = scalar_lea.vmem %s37_s28, 256  ;;  %p449_p1 = scmp.lt.s32.totalorder %s37_s28, %s37_s28 }
   0x7   :  { %p445_p0 = scmp.ne.s32.totalorder %s37_s28, %s444_s9  ;;  %p450_p2 = scmp.lt.s32.totalorder %s444_s9, %s444_s9 }
   0x9   :  { %p451_p3 = por %p450_p2, %p449_p1 }
   0xb   :  { %p452_p4 = pnand %p451_p3, %p445_p0 }
   0xd   :  { %455 = shalt.err (!%p452_p4)
}
   0xe   :  { %s588_s10 = smov 64   ;;  %s589_s11 = smov 4  }
   0xf   :  { %42 = dma.hbm_to_vmem [thread:$0]  %s700_s1, 256, %s37_s28, [#allocation6], %s588_s10, %s588_s10, %s589_s11  }
  0x10   :  { %s464_s14 = scalar_lea.vmem %s25_s30, 128  ;;  %p469_p6 = scmp.lt.s32.totalorder %s25_s30, %s25_s30 }
  0x11   :  { %p465_p5 = scmp.ne.s32.totalorder %s25_s30, %s464_s14  ;;  %p470_p7 = scmp.lt.s32.totalorder %s464_s14, %s464_s14 }
  0x13   :  { %p471_p8 = por %p470_p7, %p469_p6 }
  0x15   :  { %p472_p9 = pnand %p471_p8, %p465_p5 }
  0x17   :  { %475 = shalt.err (!%p472_p9)
}
  0x18   :  { %30 = dma.hbm_to_vmem [thread:$0]  %s699_s0, 128, %s25_s30, [#allocation3], %s588_s10, %s588_s10, %s589_s11  }
  0x19   :  { %s590_s17 = smov [#allocation7]   ;;  %s591_s19 = smov [#allocation8]  }
  0x1a   :  { %s50_s18 = sshll.u32 %s590_s17, 4  ;;  %s62_s20 = sshll.u32 %s591_s19, 4  ;;  %s51_s18 = int_to_ptr.vmem [resolvable:$true] %s50_s18  ;;  %s63_s20 = int_to_ptr.vmem [resolvable:$true] %s62_s20 }
  0x1b   :  { %s484_s1 = scalar_lea.vmem %s51_s18, 256  ;;  %p489_p11 = scmp.lt.s32.totalorder %s51_s18, %s51_s18 }
  0x1c   :  { %p485_p10 = scmp.ne.s32.totalorder %s51_s18, %s484_s1  ;;  %p490_p12 = scmp.lt.s32.totalorder %s484_s1, %s484_s1 }
  0x1e   :  { %p491_p13 = por %p490_p12, %p489_p11 }
  0x20   :  { %p492_p0 = pnand %p491_p13, %p485_p10 }
  0x22   :  { %495 = shalt.err (!%p492_p0)
}
  0x23   :  { %56 = dma.hbm_to_vmem [thread:$0]  %s702_s3, 256, %s51_s18, [#allocation6], %s588_s10, %s588_s10, %s589_s11  }
  0x24   :  { %s504_s0 = scalar_lea.vmem %s63_s20, 256  ;;  %p509_p2 = scmp.lt.s32.totalorder %s63_s20, %s63_s20 }
  0x25   :  { %p505_p1 = scmp.ne.s32.totalorder %s63_s20, %s504_s0  ;;  %p510_p3 = scmp.lt.s32.totalorder %s504_s0, %s504_s0 }
  0x27   :  { %p511_p4 = por %p510_p3, %p509_p2 }
  0x29   :  { %p512_p5 = pnand %p511_p4, %p505_p1 }
  0x2b   :  { %515 = shalt.err (!%p512_p5)
}
  0x2c   :  { %68 = dma.hbm_to_vmem [thread:$0]  %s703_s4, 256, %s63_s20, [#allocation9], %s588_s10, %s588_s10, %s589_s11  }
  0x2d   :  { %576 = dma.done.wait [#allocation3], 128  }
  0x2e   :  { %577 = vsyncadd [#allocation3], 4294967168 }
  0x2f   :  { %578 = dma.done.wait [#allocation6], 512  }
  0x30   :  { %579 = vsyncadd [#allocation6], 4294966784 }
  0x31   :  { %580 = dma.done.wait [#allocation9], 256  }
  0x32   :  { %581 = vsyncadd [#allocation9], 4294967040  ;;  %v592_v0 = vmov 0.0   ;;  %vm593_vm0 = vmmov 0   ;;  %v429_v1 = vld [vmem:[#allocation5 + $0x8] sm:$0xff]   ;;  %v430_v2 = vld [vmem:[#allocation5] sm:$0xff]  }
  0x33   :  { %394 = vmatprep.subr.bf16.mxu0 %v592_v0  ;;  %402 = vmatprep.subr.bf16.mxu1 %v592_v0  ;;  %v431_v3 = vld [vmem:[#allocation7 + $0x8] sm:$0xff]   ;;  %v433_v4 = vld [vmem:[#allocation7] sm:$0xff]   ;;  %vm114_vm1 = vcmask 261120   ;;  %v434_v6 = vld [vmem:[#allocation8 + $0x8] sm:$0xff]   ;;  %vm288_vm2 = vcmask 257024   ;;  %s594_s25 = smov [#allocation11]  }
  0x34   :  { %398 = vmatprep.mubr.msk.bf16.mxu0 %vm593_vm0, %v592_v0  ;;  %406 = vmatprep.mubr.msk.bf16.mxu1 %vm593_vm0, %v592_v0  ;;  %v432_v5 = vld [vmem:[#allocation2] sm:$0xff]   ;;  %v435_v7 = vld [vmem:[#allocation8] sm:$0xff]   ;;  %s328_s26 = sshll.u32 %s594_s25, 4  ;;  %s595_s27 = smov [#allocation10]   ;;  %s329_s26 = int_to_ptr.vmem [resolvable:$true] %s328_s26 }
  0x35   :  { %395 = vmatpush3.bf16.msra.mxu0 %v429_v1  ;;  %403 = vmatpush3.bf16.msra.mxu1 %v431_v3  ;;  %v361_v8 = vld [vmem:[%s701_s2] ss:$0 sm:$0xff]  ;;  %s316_s28 = sshll.u32 %s595_s27, 4  ;;  %s516_s30 = scalar_lea.vmem %s329_s26, 128  ;;  %s317_s28 = int_to_ptr.vmem [resolvable:$true] %s316_s28 }
  0x36   :  { %396 = vmatprep.subr.bf16.mxu0 %v592_v0  ;;  %404 = vmatprep.subr.bf16.mxu1 %v592_v0  ;;  %v369_v20 = vld [vmem:[%s704_s5] ss:$0 sm:$0xff]  ;;  %p517_p6 = scmp.ne.s32.totalorder %s329_s26, %s516_s30  ;;  %p521_p7 = scmp.lt.s32.totalorder %s329_s26, %s329_s26 }
  0x37   :  { %p522_p8 = scmp.lt.s32.totalorder %s516_s30, %s516_s30 }
  0x39   :  { %397 = vmatpush3.bf16.msra.mxu0 %v430_v2  ;;  %405 = vmatpush3.bf16.msra.mxu1 %v433_v4  ;;  %p523_p9 = por %p522_p8, %p521_p7 }
  0x3a   :  { %410 = vmatprep.subr.bf16.mxu0 %v592_v0 }
  0x3b   :  { %p524_p10 = pnand %p523_p9, %p517_p6 }
  0x3c   :  { %399 = vmatmul.mubr.msk.bf16.vlgmr.msra.gmra.mxu0 %vm114_vm1, %v432_v5  ;;  %407 = vmatmul.mubr.msk.bf16.vlgmr.msra.gmra.mxu1 %vm114_vm1, %v432_v5 }
  0x3d   :  { %411 = vmatpush3.bf16.msra.mxu0 %v434_v6  ;;  %414 = vmatprep.mubr.msk.bf16.mxu0 %vm593_vm0, %v592_v0 }
  0x3e   :  { %412 = vmatprep.subr.bf16.mxu0 %v592_v0 }
  0x41   :  { %413 = vmatpush3.bf16.msra.mxu0 %v435_v7 }
  0x44   :  { %415 = vmatmul.mubr.msk.bf16.vlgmr.msra.gmra.mxu0 %vm114_vm1, %v432_v5 }
  0xfc   :  { %v152_v9 = vpop.f32.mrf.mxu0  ;;  %v209_v12 = vpop.f32.mrf.mxu1 }
  0xfd   :  { %v153_v10 = vadd.f32 %v361_v8, %v152_v9  ;;  %v381_v14 = vpack.c.bf16 %v209_v12, %v209_v12 }
  0xfe   :  { %v400_v11 = vpop.f32.mrf.mxu0  ;;  %v408_v16 = vpop.f32.mrf.mxu1 }
  0xff   :  { %v379_v13 = vpack.c.bf16 %v153_v10, %v153_v10  ;;  %299 = vst.msk [vmem:[#allocation11] sm:$0xf] %vm288_vm2, %v381_v14 }
 0x100   :  { %v155_v15 = vpop.f32.mrf.mxu0  ;;  %v212_v19 = vpop.f32.mrf.mxu1 }
 0x101   :  { %v156_v17 = vadd.f32 %v361_v8, %v155_v15  ;;  %289 = vst.msk [vmem:[#allocation10] sm:$0xf] %vm288_vm2, %v379_v13  ;;  %v382_v22 = vpack.c.bf16 %v212_v19, %v212_v19 }
 0x102   :  { %v401_v18 = vpop.f32.mrf.mxu0  ;;  %v409_v24 = vpop.f32.mrf.mxu1 }
 0x103   :  { %v380_v21 = vpack.c.bf16 %v156_v17, %v156_v17  ;;  %300 = vst.msk [vmem:[#allocation11 + $0x4] sm:$0xf] %vm288_vm2, %v382_v22 }
 0x104   :  { %v273_v23 = vpop.f32.mrf.mxu0 }
 0x105   :  { %v274_v25 = vadd.f32 %v369_v20, %v273_v23  ;;  %290 = vst.msk [vmem:[#allocation10 + $0x4] sm:$0xf] %vm288_vm2, %v380_v21 }
 0x106   :  { %v416_v26 = vpop.f32.mrf.mxu0 }
 0x107   :  { %527 = shalt.err (!%p524_p10)
}
 0x108   :  { %334 = dma.vmem_to_hbm [thread:$0]  %s329_s26, 128, %s706_s7, [#allocation12], %s588_s10, %s588_s10, %s589_s11   ;;  %v383_v27 = vpack.c.bf16 %v274_v25, %v274_v25 }
 0x109   :  { %s536_s12 = scalar_lea.vmem %s317_s28, 128  ;;  %p541_p12 = scmp.lt.s32.totalorder %s317_s28, %s317_s28 }
 0x10a   :  { %p537_p11 = scmp.ne.s32.totalorder %s317_s28, %s536_s12  ;;  %p542_p13 = scmp.lt.s32.totalorder %s536_s12, %s536_s12 }
 0x10c   :  { %p543_p0 = por %p542_p13, %p541_p12 }
 0x10e   :  { %p544_p1 = pnand %p543_p0, %p537_p11 }
 0x110   :  { %547 = shalt.err (!%p544_p1)
}
 0x111   :  { %322 = dma.vmem_to_hbm [thread:$0]  %s317_s28, 128, %s705_s6, [#allocation4], %s588_s10, %s588_s10, %s589_s11   ;;  %v276_v28 = vpop.f32.mrf.mxu0  ;;  %309 = vst.msk [vmem:[#allocation13] sm:$0xf] %vm288_vm2, %v383_v27 }
 0x112   :  { %s596_s15 = smov [#allocation13]   ;;  %v277_v29 = vadd.f32 %v369_v20, %v276_v28 }
 0x113   :  { %s340_s16 = sshll.u32 %s596_s15, 4  ;;  %v417_v30 = vpop.f32.mrf.mxu0  ;;  %s341_s16 = int_to_ptr.vmem [resolvable:$true] %s340_s16 }
 0x114   :  { %v384_v31 = vpack.c.bf16 %v277_v29, %v277_v29  ;;  %s556_s7 = scalar_lea.vmem %s341_s16, 128  ;;  %p561_p3 = scmp.lt.s32.totalorder %s341_s16, %s341_s16 }
 0x115   :  { %p557_p2 = scmp.ne.s32.totalorder %s341_s16, %s556_s7  ;;  %p562_p4 = scmp.lt.s32.totalorder %s556_s7, %s556_s7 }
 0x116   :  { %310 = vst.msk [vmem:[#allocation13 + $0x4] sm:$0xf] %vm288_vm2, %v384_v31 }
 0x117   :  { %p563_p5 = por %p562_p4, %p561_p3 }
 0x119   :  { %p564_p6 = pnand %p563_p5, %p557_p2 }
 0x11b   :  { %567 = shalt.err (!%p564_p6)
}
 0x11c   :  { %346 = dma.vmem_to_hbm [thread:$0]  %s341_s16, 128, %s707_s8, [#allocation12], %s588_s10, %s588_s10, %s589_s11  }
 0x11d   :  { %582 = dma.done.wait [#allocation4], 128  }
 0x11e   :  { %583 = vsyncadd [#allocation4], 4294967168 }
 0x11f   :  { %584 = dma.done.wait [#allocation12], 256  }
 0x120   :  { %585 = vsyncadd [#allocation12], 4294967040 }
 0x121   :  { %356 = vsyncpa [#allocation3], 1 }
 0x122   :  { %357 = vsyncpa [#allocation6], 1 }
 0x123   :  { %358 = vsyncpa [#allocation9], 1 }
 0x124   :  { %359 = vsyncpa [#allocation4], 1 }
 0x125   :  { %360 = vsyncpa [#allocation12], 1 }

// kernel: tpu_custom_call.1
= control target key start
LH: loop header
LB: loop body
LE: loop exit
PB: predicated region body
PF: predicated region fallthrough
CT: control target
= control target key end

     0   :  { %14 = vsyncpa [#allocation3], 0  ;;  %s699_s0 = inlined_call_operand.hbm [shape: bf16[16,32], index: 0, kind: input, shape index: {}]   ;;  %s700_s1 = inlined_call_operand.hbm [shape: bf16[32,32], index: 1, kind: input, shape index: {}]   ;;  %s701_s2 = inlined_call_operand.vmem [shape: f32[1,32], index: 2, kind: input, shape index: {}]   ;;  %s702_s3 = inlined_call_operand.hbm [shape: bf16[32,32], index: 3, kind: input, shape index: {}]   ;;  %s703_s4 = inlined_call_operand.hbm [shape: bf16[32,32], index: 4, kind: input, shape index: {}]   ;;  %s704_s5 = inlined_call_operand.vmem [shape: f32[1,32], index: 5, kind: input, shape index: {}]   ;;  %s705_s6 = inlined_call_operand.hbm [shape: bf16[16,32], index: 6, kind: output, shape index: {0}]   ;;  %s706_s7 = inlined_call_operand.hbm [shape: bf16[16,32], index: 7, kind: output, shape index: {1}]   ;;  %s707_s8 = inlined_call_operand.hbm [shape: bf16[16,32], index: 8, kind: output, shape index: {2}]  }
   0x1   :  { %15 = vsyncpa [#allocation6], 0 }
   0x2   :  { %16 = vsyncpa [#allocation9], 0 }
   0x3   :  { %17 = vsyncpa [#allocation4], 0 }
   0x4   :  { %18 = vsyncpa [#allocation12], 0  ;;  %s586_s27 = smov [#allocation5]   ;;  %s587_s29 = smov [#allocation2]  }
   0x5   :  { %s36_s28 = sshll.u32 %s586_s27, 4  ;;  %s24_s30 = sshll.u32 %s587_s29, 4  ;;  %s37_s28 = int_to_ptr.vmem [resolvable:$true] %s36_s28  ;;  %s25_s30 = int_to_ptr.vmem [resolvable:$true] %s24_s30 }
   0x6   :  { %s444_s9 = scalar_lea.vmem %s37_s28, 256  ;;  %p449_p1 = scmp.lt.s32.totalorder %s37_s28, %s37_s28 }
   0x7   :  { %p445_p0 = scmp.ne.s32.totalorder %s37_s28, %s444_s9  ;;  %p450_p2 = scmp.lt.s32.totalorder %s444_s9, %s444_s9 }
   0x9   :  { %p451_p3 = por %p450_p2, %p449_p1 }
   0xb   :  { %p452_p4 = pnand %p451_p3, %p445_p0 }
   0xd   :  { %455 = shalt.err (!%p452_p4)
}
   0xe   :  { %s588_s10 = smov 64   ;;  %s589_s11 = smov 4  }
   0xf   :  { %42 = dma.hbm_to_vmem [thread:$0]  %s700_s1, 256, %s37_s28, [#allocation6], %s588_s10, %s588_s10, %s589_s11  }
  0x10   :  { %s464_s14 = scalar_lea.vmem %s25_s30, 128  ;;  %p469_p6 = scmp.lt.s32.totalorder %s25_s30, %s25_s30 }
  0x11   :  { %p465_p5 = scmp.ne.s32.totalorder %s25_s30, %s464_s14  ;;  %p470_p7 = scmp.lt.s32.totalorder %s464_s14, %s464_s14 }
  0x13   :  { %p471_p8 = por %p470_p7, %p469_p6 }
  0x15   :  { %p472_p9 = pnand %p471_p8, %p465_p5 }
  0x17   :  { %475 = shalt.err (!%p472_p9)
}
  0x18   :  { %30 = dma.hbm_to_vmem [thread:$0]  %s699_s0, 128, %s25_s30, [#allocation3], %s588_s10, %s588_s10, %s589_s11  }
  0x19   :  { %s590_s17 = smov [#allocation7]   ;;  %s591_s19 = smov [#allocation8]  }
  0x1a   :  { %s50_s18 = sshll.u32 %s590_s17, 4  ;;  %s62_s20 = sshll.u32 %s591_s19, 4  ;;  %s51_s18 = int_to_ptr.vmem [resolvable:$true] %s50_s18  ;;  %s63_s20 = int_to_ptr.vmem [resolvable:$true] %s62_s20 }
  0x1b   :  { %s484_s1 = scalar_lea.vmem %s51_s18, 256  ;;  %p489_p11 = scmp.lt.s32.totalorder %s51_s18, %s51_s18 }
  0x1c   :  { %p485_p10 = scmp.ne.s32.totalorder %s51_s18, %s484_s1  ;;  %p490_p12 = scmp.lt.s32.totalorder %s484_s1, %s484_s1 }
  0x1e   :  { %p491_p13 = por %p490_p12, %p489_p11 }
  0x20   :  { %p492_p0 = pnand %p491_p13, %p485_p10 }
  0x22   :  { %495 = shalt.err (!%p492_p0)
}
  0x23   :  { %56 = dma.hbm_to_vmem [thread:$0]  %s702_s3, 256, %s51_s18, [#allocation6], %s588_s10, %s588_s10, %s589_s11  }
  0x24   :  { %s504_s0 = scalar_lea.vmem %s63_s20, 256  ;;  %p509_p2 = scmp.lt.s32.totalorder %s63_s20, %s63_s20 }
  0x25   :  { %p505_p1 = scmp.ne.s32.totalorder %s63_s20, %s504_s0  ;;  %p510_p3 = scmp.lt.s32.totalorder %s504_s0, %s504_s0 }
  0x27   :  { %p511_p4 = por %p510_p3, %p509_p2 }
  0x29   :  { %p512_p5 = pnand %p511_p4, %p505_p1 }
  0x2b   :  { %515 = shalt.err (!%p512_p5)
}
  0x2c   :  { %68 = dma.hbm_to_vmem [thread:$0]  %s703_s4, 256, %s63_s20, [#allocation9], %s588_s10, %s588_s10, %s589_s11  }
  0x2d   :  { %576 = dma.done.wait [#allocation3], 128  }
  0x2e   :  { %577 = vsyncadd [#allocation3], 4294967168 }
  0x2f   :  { %578 = dma.done.wait [#allocation6], 512  }
  0x30   :  { %579 = vsyncadd [#allocation6], 4294966784 }
  0x31   :  { %580 = dma.done.wait [#allocation9], 256  }
  0x32   :  { %581 = vsyncadd [#allocation9], 4294967040  ;;  %v592_v0 = vmov 0.0   ;;  %vm593_vm0 = vmmov 0   ;;  %v429_v1 = vld [vmem:[#allocation5 + $0x8] sm:$0xff]   ;;  %v430_v2 = vld [vmem:[#allocation5] sm:$0xff]  }
  0x33   :  { %394 = vmatprep.subr.bf16.mxu0 %v592_v0  ;;  %402 = vmatprep.subr.bf16.mxu1 %v592_v0  ;;  %v431_v3 = vld [vmem:[#allocation7 + $0x8] sm:$0xff]   ;;  %v433_v4 = vld [vmem:[#allocation7] sm:$0xff]   ;;  %vm114_vm1 = vcmask 261120   ;;  %v434_v6 = vld [vmem:[#allocation8 + $0x8] sm:$0xff]   ;;  %vm288_vm2 = vcmask 257024   ;;  %s594_s25 = smov [#allocation11]  }
  0x34   :  { %398 = vmatprep.mubr.msk.bf16.mxu0 %vm593_vm0, %v592_v0  ;;  %406 = vmatprep.mubr.msk.bf16.mxu1 %vm593_vm0, %v592_v0  ;;  %v432_v5 = vld [vmem:[#allocation2] sm:$0xff]   ;;  %v435_v7 = vld [vmem:[#allocation8] sm:$0xff]   ;;  %s328_s26 = sshll.u32 %s594_s25, 4  ;;  %s595_s27 = smov [#allocation10]   ;;  %s329_s26 = int_to_ptr.vmem [resolvable:$true] %s328_s26 }
  0x35   :  { %395 = vmatpush3.bf16.msra.mxu0 %v429_v1  ;;  %403 = vmatpush3.bf16.msra.mxu1 %v431_v3  ;;  %v361_v8 = vld [vmem:[%s701_s2] ss:$0 sm:$0xff]  ;;  %s316_s28 = sshll.u32 %s595_s27, 4  ;;  %s516_s30 = scalar_lea.vmem %s329_s26, 128  ;;  %s317_s28 = int_to_ptr.vmem [resolvable:$true] %s316_s28 }
  0x36   :  { %396 = vmatprep.subr.bf16.mxu0 %v592_v0  ;;  %404 = vmatprep.subr.bf16.mxu1 %v592_v0  ;;  %v369_v20 = vld [vmem:[%s704_s5] ss:$0 sm:$0xff]  ;;  %p517_p6 = scmp.ne.s32.totalorder %s329_s26, %s516_s30  ;;  %p521_p7 = scmp.lt.s32.totalorder %s329_s26, %s329_s26 }
  0x37   :  { %p522_p8 = scmp.lt.s32.totalorder %s516_s30, %s516_s30 }
  0x39   :  { %397 = vmatpush3.bf16.msra.mxu0 %v430_v2  ;;  %405 = vmatpush3.bf16.msra.mxu1 %v433_v4  ;;  %p523_p9 = por %p522_p8, %p521_p7 }
  0x3a   :  { %410 = vmatprep.subr.bf16.mxu0 %v592_v0 }
  0x3b   :  { %p524_p10 = pnand %p523_p9, %p517_p6 }
  0x3c   :  { %399 = vmatmul.mubr.msk.bf16.vlgmr.msra.gmra.mxu0 %vm114_vm1, %v432_v5  ;;  %407 = vmatmul.mubr.msk.bf16.vlgmr.msra.gmra.mxu1 %vm114_vm1, %v432_v5 }
  0x3d   :  { %411 = vmatpush3.bf16.msra.mxu0 %v434_v6  ;;  %414 = vmatprep.mubr.msk.bf16.mxu0 %vm593_vm0, %v592_v0 }
  0x3e   :  { %412 = vmatprep.subr.bf16.mxu0 %v592_v0 }
  0x41   :  { %413 = vmatpush3.bf16.msra.mxu0 %v435_v7 }
  0x44   :  { %415 = vmatmul.mubr.msk.bf16.vlgmr.msra.gmra.mxu0 %vm114_vm1, %v432_v5 }
  0xfc   :  { %v152_v9 = vpop.f32.mrf.mxu0  ;;  %v209_v12 = vpop.f32.mrf.mxu1 }
  0xfd   :  { %v153_v10 = vadd.f32 %v361_v8, %v152_v9  ;;  %v381_v14 = vpack.c.bf16 %v209_v12, %v209_v12 }
  0xfe   :  { %v400_v11 = vpop.f32.mrf.mxu0  ;;  %v408_v16 = vpop.f32.mrf.mxu1 }
  0xff   :  { %v379_v13 = vpack.c.bf16 %v153_v10, %v153_v10  ;;  %299 = vst.msk [vmem:[#allocation11] sm:$0xf] %vm288_vm2, %v381_v14 }
 0x100   :  { %v155_v15 = vpop.f32.mrf.mxu0  ;;  %v212_v19 = vpop.f32.mrf.mxu1 }
 0x101   :  { %v156_v17 = vadd.f32 %v361_v8, %v155_v15  ;;  %289 = vst.msk [vmem:[#allocation10] sm:$0xf] %vm288_vm2, %v379_v13  ;;  %v382_v22 = vpack.c.bf16 %v212_v19, %v212_v19 }
 0x102   :  { %v401_v18 = vpop.f32.mrf.mxu0  ;;  %v409_v24 = vpop.f32.mrf.mxu1 }
 0x103   :  { %v380_v21 = vpack.c.bf16 %v156_v17, %v156_v17  ;;  %300 = vst.msk [vmem:[#allocation11 + $0x4] sm:$0xf] %vm288_vm2, %v382_v22 }
 0x104   :  { %v273_v23 = vpop.f32.mrf.mxu0 }
 0x105   :  { %v274_v25 = vadd.f32 %v369_v20, %v273_v23  ;;  %290 = vst.msk [vmem:[#allocation10 + $0x4] sm:$0xf] %vm288_vm2, %v380_v21 }
 0x106   :  { %v416_v26 = vpop.f32.mrf.mxu0 }
 0x107   :  { %527 = shalt.err (!%p524_p10)
}
 0x108   :  { %334 = dma.vmem_to_hbm [thread:$0]  %s329_s26, 128, %s706_s7, [#allocation12], %s588_s10, %s588_s10, %s589_s11   ;;  %v383_v27 = vpack.c.bf16 %v274_v25, %v274_v25 }
 0x109   :  { %s536_s12 = scalar_lea.vmem %s317_s28, 128  ;;  %p541_p12 = scmp.lt.s32.totalorder %s317_s28, %s317_s28 }
 0x10a   :  { %p537_p11 = scmp.ne.s32.totalorder %s317_s28, %s536_s12  ;;  %p542_p13 = scmp.lt.s32.totalorder %s536_s12, %s536_s12 }
 0x10c   :  { %p543_p0 = por %p542_p13, %p541_p12 }
 0x10e   :  { %p544_p1 = pnand %p543_p0, %p537_p11 }
 0x110   :  { %547 = shalt.err (!%p544_p1)
}
 0x111   :  { %322 = dma.vmem_to_hbm [thread:$0]  %s317_s28, 128, %s705_s6, [#allocation4], %s588_s10, %s588_s10, %s589_s11   ;;  %v276_v28 = vpop.f32.mrf.mxu0  ;;  %309 = vst.msk [vmem:[#allocation13] sm:$0xf] %vm288_vm2, %v383_v27 }
 0x112   :  { %s596_s15 = smov [#allocation13]   ;;  %v277_v29 = vadd.f32 %v369_v20, %v276_v28 }
 0x113   :  { %s340_s16 = sshll.u32 %s596_s15, 4  ;;  %v417_v30 = vpop.f32.mrf.mxu0  ;;  %s341_s16 = int_to_ptr.vmem [resolvable:$true] %s340_s16 }
 0x114   :  { %v384_v31 = vpack.c.bf16 %v277_v29, %v277_v29  ;;  %s556_s7 = scalar_lea.vmem %s341_s16, 128  ;;  %p561_p3 = scmp.lt.s32.totalorder %s341_s16, %s341_s16 }
 0x115   :  { %p557_p2 = scmp.ne.s32.totalorder %s341_s16, %s556_s7  ;;  %p562_p4 = scmp.lt.s32.totalorder %s556_s7, %s556_s7 }
 0x116   :  { %310 = vst.msk [vmem:[#allocation13 + $0x4] sm:$0xf] %vm288_vm2, %v384_v31 }
 0x117   :  { %p563_p5 = por %p562_p4, %p561_p3 }
 0x119   :  { %p564_p6 = pnand %p563_p5, %p557_p2 }
 0x11b   :  { %567 = shalt.err (!%p564_p6)
}
 0x11c   :  { %346 = dma.vmem_to_hbm [thread:$0]  %s341_s16, 128, %s707_s8, [#allocation12], %s588_s10, %s588_s10, %s589_s11  }
 0x11d   :  { %582 = dma.done.wait [#allocation4], 128  }
 0x11e   :  { %583 = vsyncadd [#allocation4], 4294967168 }
 0x11f   :  { %584 = dma.done.wait [#allocation12], 256  }
 0x120   :  { %585 = vsyncadd [#allocation12], 4294967040 }
 0x121   :  { %356 = vsyncpa [#allocation3], 1 }
 0x122   :  { %357 = vsyncpa [#allocation6], 1 }
 0x123   :  { %358 = vsyncpa [#allocation9], 1 }
 0x124   :  { %359 = vsyncpa [#allocation4], 1 }
 0x125   :  { %360 = vsyncpa [#allocation12], 1 }

</bundles_post_ra>
